<compile_context>
chip_gen: v7x
topology: tpu7x:2x2x1
jax: 0.10.0
libtpu: 0.0.40
codegen_flags: <defaults>
</compile_context>

<pallas_src>
import functools

import jax
import jax.numpy as jnp
from jax.experimental import pallas as pl
from jax.experimental.pallas import tpu as pltpu


def _round_up(x, m):
    return ((x + m - 1) // m) * m


# ----------------------------- Pallas kernel -------------------------------

def _feedforward_kernel(x_ref, g_ref, beta_ref, w1_ref, b1_ref, w2_ref, b2_ref,
                        o_ref, *, eps, do_ln):
    x = x_ref[...]                                              # (TM, Din) f32
    if do_ln:
        mu = jnp.mean(x, axis=-1, keepdims=True)
        xc = x - mu
        var = jnp.mean(xc * xc, axis=-1, keepdims=True)
        x = xc * jax.lax.rsqrt(var + eps) * g_ref[...] + beta_ref[...]

    # GEMM 1 (+bias): bf16 operands, f32 accumulation on the MXU.
    h = jnp.dot(x.astype(w1_ref.dtype), w1_ref[...],
                preferred_element_type=jnp.float32) + b1_ref[...]
    # Exact GELU (erf), matching torch.nn.GELU default; erf runs on the EUP slot.
    h = 0.5 * h * (1.0 + jax.lax.erf(h * 0.7071067811865476))
    # GEMM 2 (+bias).
    o = jnp.dot(h.astype(w2_ref.dtype), w2_ref[...],
                preferred_element_type=jnp.float32) + b2_ref[...]
    o_ref[...] = o.astype(o_ref.dtype)


# ----------------------------- wrappers -------------------------------------

def prepare_params(params, mxu_dtype=jnp.bfloat16):
    """One-time parameter prep (outside the hot path / jit):
    pad hidden/out dims to lane multiples of 128 and cast GEMM weights to bf16.
    Zero padding is exact: GELU(0)=0 and padded W2 rows/cols are zero, so padded
    hidden/output lanes contribute nothing and are sliced off after the kernel."""
    w1, b1 = params["w1"], params["b1"]
    w2, b2 = params["w2"], params["b2"]
    in_dim, hidden = w1.shape
    out_dim = w2.shape[1]
    hid_p = _round_up(hidden, 128)
    out_p = _round_up(out_dim, 128)

    w1p = jnp.zeros((in_dim, hid_p), jnp.float32).at[:, :hidden].set(w1).astype(mxu_dtype)
    b1p = jnp.zeros((1, hid_p), jnp.float32).at[0, :hidden].set(b1)
    w2p = jnp.zeros((hid_p, out_p), jnp.float32).at[:hidden, :out_dim].set(w2).astype(mxu_dtype)
    b2p = jnp.zeros((1, out_p), jnp.float32).at[0, :out_dim].set(b2)

    return {
        "ln_g": params["ln_g"].reshape(1, in_dim).astype(jnp.float32),
        "ln_b": params["ln_b"].reshape(1, in_dim).astype(jnp.float32),
        "w1": w1p, "b1": b1p, "w2": w2p, "b2": b2p,
    }


def feedforward(x, pp, *, out_dim, eps=1e-5, do_ln=True, block_rows=256):
    """x: (..., in_dim). pp: output of prepare_params. Returns (..., out_dim)."""
    in_dim = pp["ln_g"].shape[1]
    hid_p = pp["w1"].shape[1]
    out_p = pp["w2"].shape[1]

    lead = x.shape[:-1]
    x2d = x.reshape(-1, in_dim).astype(jnp.float32)
    n = x2d.shape[0]

    # Row tile: multiple of 8 (sublane), capped by the (padded) row count.
    tm = max(8, min(_round_up(block_rows, 8), _round_up(n, 8)))
    n_pad = _round_up(n, tm)
    if n_pad != n:
        x2d = jnp.pad(x2d, ((0, n_pad - n), (0, 0)))
    grid = (n_pad // tm,)

    out = pl.pallas_call(
        functools.partial(_feedforward_kernel, eps=eps, do_ln=do_ln),
        out_shape=jax.ShapeDtypeStruct((n_pad, out_p), jnp.float32),
        grid=grid,
        in_specs=[
            pl.BlockSpec((tm, in_dim), lambda i: (i, 0)),     # activations: row-tiled
            pl.BlockSpec((1, in_dim), lambda i: (0, 0)),      # LN gamma (resident)
            pl.BlockSpec((1, in_dim), lambda i: (0, 0)),      # LN beta  (resident)
            pl.BlockSpec((in_dim, hid_p), lambda i: (0, 0)),  # W1 bf16  (resident)
            pl.BlockSpec((1, hid_p), lambda i: (0, 0)),       # b1 f32   (resident)
            pl.BlockSpec((hid_p, out_p), lambda i: (0, 0)),   # W2 bf16  (resident)
            pl.BlockSpec((1, out_p), lambda i: (0, 0)),       # b2 f32   (resident)
        ],
        out_specs=pl.BlockSpec((tm, out_p), lambda i: (i, 0)),  # lane-dense (128-mult)
        compiler_params=pltpu.CompilerParams(
            dimension_semantics=("parallel",),        # shards row tiles across TCs (v7x)
            vmem_limit_bytes=32 * 1024 * 1024,        # explicit; safe on v5e/v6e/v7x
        ),
    )(x2d, pp["ln_g"], pp["ln_b"], pp["w1"], pp["b1"], pp["w2"], pp["b2"])

    return out[:n, :out_dim].reshape(*lead, out_dim)


# ----------------------------- pure-JAX reference ---------------------------

def feedforward_ref(x, params, *, eps=1e-5, do_ln=True):
    xf = x.astype(jnp.float32)
    if do_ln:
        mu = jnp.mean(xf, axis=-1, keepdims=True)
        var = jnp.mean((xf - mu) ** 2, axis=-1, keepdims=True)
        xf = (xf - mu) * jax.lax.rsqrt(var + eps) * params["ln_g"] + params["ln_b"]
    h = xf @ params["w1"] + params["b1"]
    h = 0.5 * h * (1.0 + jax.lax.erf(h * 0.7071067811865476))
    return h @ params["w2"] + params["b2"]


# ----------------------------- main ------------------------------------------

if __name__ == "__main__":
    # Small shapes consistent with the module: FeedForward(in_dim=32, hidden=64, out=32),
    # applied to x of shape (seq=8, batch=2, in_dim=32).
    in_dim, hidden_dim, out_dim = 32, 64, 32
    seq, batch = 8, 2
    eps = 1e-5  # nn.LayerNorm default

    key = jax.random.PRNGKey(0)
    kx, k1, k2, k3, k4 = jax.random.split(key, 5)
    x = jax.random.normal(kx, (seq, batch, in_dim), dtype=jnp.float32)

    params = {
        "ln_g": jnp.ones((in_dim,), jnp.float32),
        "ln_b": jnp.zeros((in_dim,), jnp.float32),
        "w1": 0.02 * jax.random.normal(k1, (in_dim, hidden_dim), dtype=jnp.float32),
        "b1": 0.02 * jax.random.normal(k2, (hidden_dim,), dtype=jnp.float32),
        "w2": 0.02 * jax.random.normal(k3, (hidden_dim, out_dim), dtype=jnp.float32),
        "b2": 0.02 * jax.random.normal(k4, (out_dim,), dtype=jnp.float32),
    }

    pp = prepare_params(params)  # lane-pad + bf16 MXU weights, once, outside jit

    fwd = jax.jit(functools.partial(feedforward, out_dim=out_dim, eps=eps,
                                    do_ln=True, block_rows=8))
    out = fwd(x, pp)
    jax.block_until_ready(out)

    assert out.shape == (seq, batch, out_dim)
    assert bool(jnp.all(jnp.isfinite(out)))

    # Sanity check vs. f32 reference (loose tolerance: kernel uses bf16 MXU operands
    # with f32 accumulation, an approved inference-time approximation).
    ref = feedforward_ref(x, params, eps=eps, do_ln=True)
    assert bool(jnp.allclose(out, ref, atol=2e-2, rtol=2e-1)), \
        float(jnp.max(jnp.abs(out - ref)))

    print("KERNEL_OK")
</pallas_src>

<mosaic_0001>
module attributes {stable_mosaic.version = 11 : i64} {
  func.func @_feedforward_kernel(%arg0: i32, %arg1: memref<8x32xf32, #tpu.memory_space<vmem>>, %arg2: memref<1x32xf32, #tpu.memory_space<vmem>>, %arg3: memref<1x32xf32, #tpu.memory_space<vmem>>, %arg4: memref<32x128xbf16, #tpu.memory_space<vmem>>, %arg5: memref<1x128xf32, #tpu.memory_space<vmem>>, %arg6: memref<128x128xbf16, #tpu.memory_space<vmem>>, %arg7: memref<1x128xf32, #tpu.memory_space<vmem>>, %arg8: memref<8x128xf32, #tpu.memory_space<vmem>>) attributes {dimension_semantics = [#tpu.dimension_semantics<parallel>], iteration_bounds = array<i64: 2>, scalar_prefetch = 0 : i64, scratch_operands = 0 : i64, tpu.core_type = #tpu.core_type<tc>, window_params = [{transform_indices = @transform_0, window_bounds = array<i64: 8, 32>}, {pipeline_mode = #tpu.pipeline_mode<synchronous>, transform_indices = @transform_1, window_bounds = array<i64: 1, 32>}, {pipeline_mode = #tpu.pipeline_mode<synchronous>, transform_indices = @transform_2, window_bounds = array<i64: 1, 32>}, {pipeline_mode = #tpu.pipeline_mode<synchronous>, transform_indices = @transform_3, window_bounds = array<i64: 32, 128>}, {pipeline_mode = #tpu.pipeline_mode<synchronous>, transform_indices = @transform_4, window_bounds = array<i64: 1, 128>}, {pipeline_mode = #tpu.pipeline_mode<synchronous>, transform_indices = @transform_5, window_bounds = array<i64: 128, 128>}, {pipeline_mode = #tpu.pipeline_mode<synchronous>, transform_indices = @transform_6, window_bounds = array<i64: 1, 128>}, {transform_indices = @transform_7, window_bounds = array<i64: 8, 128>}]} {
    %c0 = arith.constant 0 : index
    %c0_0 = arith.constant 0 : index
    %0 = vector.load %arg1[%c0, %c0_0] : memref<8x32xf32, #tpu.memory_space<vmem>>, vector<8x32xf32>
    %cst = arith.constant dense<0.000000e+00> : vector<8xf32>
    %1 = vector.multi_reduction <add>, %0, %cst [1] : vector<8x32xf32> to vector<8xf32>
    %2 = vector.shape_cast %1 : vector<8xf32> to vector<8x1xf32>
    %cst_1 = arith.constant 3.200000e+01 : f32
    %3 = vector.broadcast %cst_1 : f32 to vector<8x1xf32>
    %4 = arith.divf %2, %3 : vector<8x1xf32>
    %5 = vector.broadcast %4 : vector<8x1xf32> to vector<8x32xf32>
    %6 = arith.subf %0, %5 : vector<8x32xf32>
    %7 = arith.mulf %6, %6 : vector<8x32xf32>
    %cst_2 = arith.constant dense<0.000000e+00> : vector<8xf32>
    %8 = vector.multi_reduction <add>, %7, %cst_2 [1] : vector<8x32xf32> to vector<8xf32>
    %9 = vector.shape_cast %8 : vector<8xf32> to vector<8x1xf32>
    %cst_3 = arith.constant 3.200000e+01 : f32
    %10 = vector.broadcast %cst_3 : f32 to vector<8x1xf32>
    %11 = arith.divf %9, %10 : vector<8x1xf32>
    %cst_4 = arith.constant 9.99999974E-6 : f32
    %12 = vector.broadcast %cst_4 : f32 to vector<8x1xf32>
    %13 = arith.addf %11, %12 : vector<8x1xf32>
    %14 = math.rsqrt %13 : vector<8x1xf32>
    %15 = vector.broadcast %14 : vector<8x1xf32> to vector<8x32xf32>
    %16 = arith.mulf %6, %15 : vector<8x32xf32>
    %c0_5 = arith.constant 0 : index
    %c0_6 = arith.constant 0 : index
    %17 = vector.load %arg2[%c0_5, %c0_6] : memref<1x32xf32, #tpu.memory_space<vmem>>, vector<1x32xf32>
    %18 = vector.broadcast %17 : vector<1x32xf32> to vector<8x32xf32>
    %19 = arith.mulf %16, %18 : vector<8x32xf32>
    %c0_7 = arith.constant 0 : index
    %c0_8 = arith.constant 0 : index
    %20 = vector.load %arg3[%c0_7, %c0_8] : memref<1x32xf32, #tpu.memory_space<vmem>>, vector<1x32xf32>
    %21 = vector.broadcast %20 : vector<1x32xf32> to vector<8x32xf32>
    %22 = arith.addf %19, %21 : vector<8x32xf32>
    %23 = arith.truncf %22 : vector<8x32xf32> to vector<8x32xbf16>
    %c0_9 = arith.constant 0 : index
    %c0_10 = arith.constant 0 : index
    %24 = vector.load %arg4[%c0_9, %c0_10] : memref<32x128xbf16, #tpu.memory_space<vmem>>, vector<32x128xbf16>
    %cst_11 = arith.constant dense<0.000000e+00> : vector<8x128xf32>
    %25 = tpu.matmul %23, %24, %cst_11 {dimension_numbers = #tpu.dot_dimension_numbers<[1], [0], [0], [1], [0, 0, 1, 1], [], []>} : vector<8x32xbf16>, vector<32x128xbf16>, vector<8x128xf32> -> vector<8x128xf32>
    %c0_12 = arith.constant 0 : index
    %c0_13 = arith.constant 0 : index
    %26 = vector.load %arg5[%c0_12, %c0_13] : memref<1x128xf32, #tpu.memory_space<vmem>>, vector<1x128xf32>
    %27 = vector.broadcast %26 : vector<1x128xf32> to vector<8x128xf32>
    %28 = arith.addf %25, %27 : vector<8x128xf32>
    %cst_14 = arith.constant 5.000000e-01 : f32
    %29 = vector.broadcast %cst_14 : f32 to vector<8x128xf32>
    %30 = arith.mulf %29, %28 : vector<8x128xf32>
    %cst_15 = arith.constant 0.707106769 : f32
    %31 = vector.broadcast %cst_15 : f32 to vector<8x128xf32>
    %32 = arith.mulf %28, %31 : vector<8x128xf32>
    %33 = math.erf %32 : vector<8x128xf32>
    %cst_16 = arith.constant 1.000000e+00 : f32
    %34 = vector.broadcast %cst_16 : f32 to vector<8x128xf32>
    %35 = arith.addf %34, %33 : vector<8x128xf32>
    %36 = arith.mulf %30, %35 : vector<8x128xf32>
    %37 = arith.truncf %36 : vector<8x128xf32> to vector<8x128xbf16>
    %c0_17 = arith.constant 0 : index
    %c0_18 = arith.constant 0 : index
    %38 = vector.load %arg6[%c0_17, %c0_18] : memref<128x128xbf16, #tpu.memory_space<vmem>>, vector<128x128xbf16>
    %cst_19 = arith.constant dense<0.000000e+00> : vector<8x128xf32>
    %39 = tpu.matmul %37, %38, %cst_19 {dimension_numbers = #tpu.dot_dimension_numbers<[1], [0], [0], [1], [0, 0, 1, 1], [], []>} : vector<8x128xbf16>, vector<128x128xbf16>, vector<8x128xf32> -> vector<8x128xf32>
    %c0_20 = arith.constant 0 : index
    %c0_21 = arith.constant 0 : index
    %40 = vector.load %arg7[%c0_20, %c0_21] : memref<1x128xf32, #tpu.memory_space<vmem>>, vector<1x128xf32>
    %41 = vector.broadcast %40 : vector<1x128xf32> to vector<8x128xf32>
    %42 = arith.addf %39, %41 : vector<8x128xf32>
    %c0_22 = arith.constant 0 : index
    %c0_23 = arith.constant 0 : index
    %43 = vector.load %arg8[%c0_22, %c0_23] : memref<8x128xf32, #tpu.memory_space<vmem>>, vector<8x128xf32>
    tpu.vector_store %arg8[%c0_22, %c0_23], %42 {strides = array<i32>} : memref<8x128xf32, #tpu.memory_space<vmem>>, vector<8x128xf32>,
    return
  }
  func.func @transform_0(%arg0: i32) -> (i32, i32) {
    %c0_i32 = arith.constant 0 : i32
    %c0_i32_0 = arith.constant 0 : i32
    return %arg0, %c0_i32 : i32, i32
  }
  func.func @transform_1(%arg0: i32) -> (i32, i32) {
    %c0_i32 = arith.constant 0 : i32
    %c0_i32_0 = arith.constant 0 : i32
    %c0_i32_1 = arith.constant 0 : i32
    return %c0_i32, %c0_i32_0 : i32, i32
  }
  func.func @transform_2(%arg0: i32) -> (i32, i32) {
    %c0_i32 = arith.constant 0 : i32
    %c0_i32_0 = arith.constant 0 : i32
    %c0_i32_1 = arith.constant 0 : i32
    return %c0_i32, %c0_i32_0 : i32, i32
  }
  func.func @transform_3(%arg0: i32) -> (i32, i32) {
    %c0_i32 = arith.constant 0 : i32
    %c0_i32_0 = arith.constant 0 : i32
    %c0_i32_1 = arith.constant 0 : i32
    return %c0_i32, %c0_i32_0 : i32, i32
  }
  func.func @transform_4(%arg0: i32) -> (i32, i32) {
    %c0_i32 = arith.constant 0 : i32
    %c0_i32_0 = arith.constant 0 : i32
    %c0_i32_1 = arith.constant 0 : i32
    return %c0_i32, %c0_i32_0 : i32, i32
  }
  func.func @transform_5(%arg0: i32) -> (i32, i32) {
    %c0_i32 = arith.constant 0 : i32
    %c0_i32_0 = arith.constant 0 : i32
    %c0_i32_1 = arith.constant 0 : i32
    return %c0_i32, %c0_i32_0 : i32, i32
  }
  func.func @transform_6(%arg0: i32) -> (i32, i32) {
    %c0_i32 = arith.constant 0 : i32
    %c0_i32_0 = arith.constant 0 : i32
    %c0_i32_1 = arith.constant 0 : i32
    return %c0_i32, %c0_i32_0 : i32, i32
  }
  func.func @transform_7(%arg0: i32) -> (i32, i32) {
    %c0_i32 = arith.constant 0 : i32
    %c0_i32_0 = arith.constant 0 : i32
    return %arg0, %c0_i32 : i32, i32
  }
}

</mosaic_0001>

<bundles_post_ra>
// kernel: feedforward.1
= control target key start
LH: loop header
LB: loop body
LE: loop exit
PB: predicated region body
PF: predicated region fallthrough
CT: control target
= control target key end

     0   :  { %12 = vsyncpa [#allocation3], 0  ;;  %s1163_s0 = inlined_call_operand.hbm [shape: f32[16,32], index: 0, kind: input, shape index: {}]   ;;  %s1164_s1 = inlined_call_operand.vmem [shape: f32[1,32], index: 1, kind: input, shape index: {}]   ;;  %s1165_s2 = inlined_call_operand.vmem [shape: f32[1,32], index: 2, kind: input, shape index: {}]   ;;  %s1166_s3 = inlined_call_operand.vmem [shape: bf16[32,128], index: 3, kind: input, shape index: {}]   ;;  %s1167_s4 = inlined_call_operand.vmem [shape: f32[1,128], index: 4, kind: input, shape index: {}]   ;;  %s1168_s5 = inlined_call_operand.hbm [shape: bf16[128,128], index: 5, kind: input, shape index: {}]   ;;  %s1169_s6 = inlined_call_operand.vmem [shape: f32[1,128], index: 6, kind: input, shape index: {}]   ;;  %s1170_s7 = inlined_call_operand.hbm [shape: f32[16,128], index: 7, kind: output, shape index: {}]  }
   0x1   :  { %14 = vsyncpa [#allocation3 + $0x1], 0 }
   0x2   :  { %15 = vsyncpa [#allocation6], 0 }
   0x3   :  { %16 = vsyncpa [#allocation4], 0 }
   0x4   :  { %18 = vsyncpa [#allocation4 + $0x1], 0  ;;  %s942_s24 = smov 0   ;;  %s944_s25 = smov 0  }
   0x5   :  { %s946_s26 = smov 0   ;;  %s948_s27 = smov 0  }
   0x6 LB: > { %s963_s28 = sadd.s32 4294967295, %s893_s27   ;;  %s621_s29 = sadd.s32 4294967294, %s893_s27   ;;  %s893_s27 = sphi %s948_s27, %s1190_s27   ;;  %s889_s26 = sphi %s946_s26, %s1189_s26   ;;  %s885_s25 = sphi %s944_s25, %s1188_s25   ;;  %s881_s24 = sphi %s942_s24, %s1187_s24  }
   0x7   : > { %p44_p0 = scmp.ne.s32.totalorder %s885_s25, %s881_s24  ;;  %p1171_p1 = scmp.eq.s32.totalorder %s963_s28, 0 }
   0x8   : > { %p200_p3 = scmp.eq.s32.totalorder %s621_s29, 1  ;;  %p622_p5 = scmp.ge.s32.totalorder %s893_s27, 1 }
   0x9   : > { %p972_p4 = por %p1171_p1, %p44_p0  ;;  %p207_p7 = scmp.lt.s32.totalorder %s893_s27, 3 }
   0xa   : > { %p977_p6 = por %p200_p3, %p44_p0  ;;  %s895_s10 = smov [#allocation5]  }
   0xb   : > { %s1174_s30 = scalar_select %p972_p4, 1, 0 }
   0xc   : > { %s1175_s8 = scalar_select %p977_p6, 1, 0 }
   0xd   : > { %p982_p8 = pnand %p622_p5, %p207_p7  ;;  %s231_s11 = sshll.u32 %s895_s10, 4  ;;  %s986_s11 = int_to_ptr.vmem [resolvable:$true] %s231_s11 }
   0xe   : > { %s998_s13 = sadd.s32 1, %s893_s27   ;;  %s31_s14 = sadd.s32 1, %s889_s26 }
   0xf   : > { %s1176_s9 = scalar_select %p982_p8, 1, 0 }
  0x10   : > { %p698_p9 = pneg %p982_p8  ;;  %s28_s15 = ssub.s32 %s893_s27, %s998_s13 }
  0x11   : > { %s765_s18 = scalar_lea.hbm %s1168_s5, 1024 }
  0x12   : > { %p993_p11 = pnand %p698_p9, %p1171_p1  ;;  %p766_p12 = scmp.ne.s32.totalorder %s1168_s5, %s765_s18 }
  0x13   : > { %p772_p5 = scmp.lt.u32.totalorder %s765_s18, %s1168_s5 }
  0x14   : > { %p767_p13 = pneg %p993_p11 }
  0x16   : > { %p768_p0 = pnand %p767_p13, %p766_p12 }
  0x18   : > { %p769_p3 = pneg %p768_p0 }
  0x1a   : > { %p774_p7 = pnand %p772_p5, %p769_p3 }
  0x1c   : > { %777 = shalt.err (!%p774_p7)
}
  0x1d   : > { %s778_s23 = scalar_lea.vmem %s986_s11, 1024  ;;  %p786_p2 = scmp.lt.s32.totalorder %s986_s11, %s986_s11 }
  0x1e   : > { %p779_p9 = scmp.ne.s32.totalorder %s986_s11, %s778_s23  ;;  %p787_p6 = scmp.lt.s32.totalorder %s778_s23, %s778_s23 }
  0x20   : > { %p781_p10 = pnand %p779_p9, %p767_p13  ;;  %p788_p4 = por %p787_p6, %p786_p2 }
  0x22   : > { %p782_p1 = pneg %p781_p10 }
  0x24   : > { %p789_p8 = pnand %p788_p4, %p782_p1 }
  0x26   : > { %792 = shalt.err (!%p789_p8)
}
  0x27   : > { %s896_s29 = smov 64   ;;  %s897_s10 = smov 4  }
  0x28   : > { %701 = dma.hbm_to_vmem [thread:$0]  (!%p993_p11), %s1168_s5, 1024, %s986_s11, [#allocation6], %s896_s29, %s896_s29, %s897_s10  }
  0x29   : > { %p29_p2 = scmp.eq.s32.totalorder %s28_s15, 0  ;;  %p38_p1 = scmp.ne.s32.totalorder %s889_s26, %s885_s25 }
  0x2a   : > { %p39_p4 = scmp.eq.s32.totalorder %s893_s27, 0  ;;  %p711_p6 = scmp.lt.s32.totalorder %s893_s27, 2 }
  0x2b   : > { %s1029_s18 = scalar_select %p29_p2, %s889_s26, %s31_s14  }
  0x2c   : > { %p40_p8 = por %p39_p4, %p38_p1  ;;  %p1178_p10 = scmp.eq.s32.totalorder %s963_s28, 1 }
  0x2d   : > { %s248_s20 = sand.u32 1, %s889_s26   ;;  %s626_s21 = sshll.u32 %s893_s27, 7 }
  0x2e   : > { %p1033_p12 = por %p1178_p10, %p38_p1  ;;  %s625_s22 = sshll.u32 %s248_s20, 3 }
  0x2f   : > { %s1042_s16 = scalar_lea.hbm %s1163_s0, %s626_s21  ;;  %s252_s11 = scalar_lea.vmem [#allocation2], %s625_s22 }
  0x30   : > { %s259_s14 = sshll.u32 %s252_s11, 4  ;;  %p1044_p11 = pnand %p711_p6, %p40_p8  ;;  %s1048_s14 = int_to_ptr.vmem [resolvable:$true] %s259_s14 }
  0x31   : > { %s249_s29 = scalar_lea.sflag [#allocation3], %s248_s20  ;;  %s793_s10 = scalar_lea.hbm %s1042_s16, 128 }
  0x32   : > { %p794_p13 = scmp.ne.s32.totalorder %s1042_s16, %s793_s10  ;;  %p795_p0 = pneg %p1044_p11 }
  0x33   : > { %s798_s22 = scalar_lea.hbm %s1163_s0, 256  ;;  %p799_p7 = scmp.lt.u32.totalorder %s1042_s16, %s1163_s0 }
  0x34   : > { %p796_p3 = pnand %p795_p0, %p794_p13  ;;  %p800_p9 = scmp.lt.u32.totalorder %s798_s22, %s793_s10 }
  0x35   : > { %p802_p1 = scmp.lt.u32.totalorder %s793_s10, %s1042_s16 }
  0x36   : > { %p797_p5 = pneg %p796_p3  ;;  %p801_p2 = por %p800_p9, %p799_p7 }
  0x38   : > { %p803_p4 = por %p802_p1, %p801_p2 }
  0x3a   : > { %p804_p6 = pnand %p803_p4, %p797_p5 }
  0x3c   : > { %807 = shalt.err (!%p804_p6)
}
  0x3d   : > { %s808_s20 = scalar_lea.vmem %s1048_s14, 128  ;;  %s898_s11 = smov [#allocation2]  }
  0x3e   : > { %p809_p8 = scmp.ne.s32.totalorder %s1048_s14, %s808_s20  ;;  %s813_s17 = sshll.u32 %s898_s11, 4  ;;  %s814_s17 = int_to_ptr.vmem [resolvable:$false] %s813_s17 }
  0x3f   : > { %s815_s21 = scalar_lea.vmem %s814_s17, 256  ;;  %p816_p3 = scmp.lt.s32.totalorder %s1048_s14, %s814_s17 }
  0x40   : > { %p811_p10 = pnand %p809_p8, %p795_p0  ;;  %p817_p7 = scmp.lt.s32.totalorder %s815_s21, %s808_s20 }
  0x42   : > { %p812_p13 = pneg %p811_p10  ;;  %p818_p9 = por %p817_p7, %p816_p3 }
  0x44   : > { %p819_p2 = pnand %p818_p9, %p812_p13 }
  0x46   : > { %822 = shalt.err (!%p819_p2)
}
  0x47   : > { %705 = dma.hbm_to_vmem [thread:$0]  (!%p1044_p11), %s1042_s16, 128, %s1048_s14, %s249_s29  }
  0x48   : > { %p1181_p5 = scmp.ne.s32.totalorder %s1176_s9, 0 }
  0x49   : > { %s1078_s10 = sand.u32 (!%p1181_p5), 1, %s885_s25   ;;  %p1182_p0 = scmp.ne.s32.totalorder (!%p1181_p5), %s1174_s30, 0 }
  0x4a   : > { %268 = sbr.rel (%p1181_p5) target bundleno = 862 (0x35e), region = 48  ;;  %s628_s22 = sshll.u32 (!%p1181_p5), %s1078_s10, 3 }
  0x4b   : > { %s271_s12 = scalar_lea.sflag (!%p1181_p5), [#allocation3], %s1078_s10  ;;  %s274_s23 = scalar_lea.vmem (!%p1181_p5), [#allocation2], %s628_s22 }
  0x51   : > { %868 = dma.done.wait (%p1182_p0), %s271_s12, 128  }
  0x52   : > { %870 = vsyncadd (%p1182_p0), %s271_s12, 4294967168  ;;  %p1183_p11 = scmp.eq.s32.totalorder %s963_s28, 0 }
  0x54   : > { %872 = dma.done.wait (%p1183_p11), [#allocation6], 1024   ;;  %p1184_p1 = pmov %p1183_p11 }
  0x55   : > { %vm311_vm0 = vcmask 261120   ;;  %v310_v0 = vld [vmem:[%s274_s23] sm:$0xff]  ;;  %v899_v8 = vmov 0.0   ;;  %vm900_vm1 = vmmov 0   ;;  %v753_v10 = vld [vmem:[#allocation5] sm:$0xff]   ;;  %v754_v11 = vld [vmem:[#allocation5 + $0x8] sm:$0xff]  }
  0x56   : > { %874 = vsyncadd (%p1184_p1), [#allocation6], 4294966272  ;;  %v312_v1 = vsel %vm311_vm0, %v310_v0, 0.0  ;;  %v751_v7 = vld [vmem:[%s1166_s3] sm:$0xff]   ;;  %662 = vmatprep.subr.bf16.mxu0 %v899_v8  ;;  %670 = vmatprep.subr.bf16.mxu1 %v899_v8  ;;  %v752_v9 = vld [vmem:[%s1166_s3 + $0x8] sm:$0xff]   ;;  %s647_s30 = sshll.u32 %s963_s28, 7 }
  0x57   : > { %313 = vadd.xlane.f32.xlu0 %v312_v1  ;;  %663 = vmatpush3.bf16.msra.mxu0 %v751_v7  ;;  %v755_v12 = vld [vmem:[#allocation5 + $0x10] sm:$0xff]   ;;  %v756_v23 = vld [vmem:[#allocation5 + $0x18] sm:$0xff]   ;;  %v757_v24 = vld [vmem:[#allocation5 + $0x20] sm:$0xff]   ;;  %s308_s9 = scalar_lea.vmem [#allocation7], %s628_s22  ;;  %s1119_s29 = scalar_lea.hbm %s1170_s7, %s647_s30 }
  0x58   : > { %666 = vmatprep.mubr.msk.bf16.mxu0 %vm900_vm1, %v899_v8  ;;  %664 = vmatprep.subr.bf16.mxu0 %v899_v8  ;;  %v631_v17 = vld [vmem:[%s1164_s1] ss:$0 sm:$0xff]  ;;  %v758_v25 = vld [vmem:[#allocation5 + $0x28] sm:$0xff]   ;;  %v760_v27 = vld [vmem:[#allocation5 + $0x38] sm:$0xff]   ;;  %s541_s16 = sshll.u32 %s308_s9, 4  ;;  %s528_s28 = scalar_lea.sflag [#allocation4], %s1078_s10  ;;  %s1121_s16 = int_to_ptr.vmem [resolvable:$true] %s541_s16 }
  0x59   : > { %686 = vmatprep.mubr.msk.bf16.mxu1 %vm900_vm1, %v899_v8  ;;  %671 = vmatpush3.bf16.msra.mxu1 %v753_v10  ;;  %v632_v19 = vld [vmem:[%s1165_s2] ss:$0 sm:$0xff]  ;;  %s823_s20 = scalar_lea.vmem %s1121_s16, 128  ;;  %s901_s22 = smov [#allocation7]  }
  0x5a   : > { %672 = vmatprep.subr.bf16.mxu1 %v899_v8  ;;  %v759_v26 = vld [vmem:[#allocation5 + $0x30] sm:$0xff]   ;;  %p824_p4 = scmp.ne.s32.totalorder %s1121_s16, %s823_s20  ;;  %s827_s11 = sshll.u32 %s901_s22, 4  ;;  %s828_s11 = int_to_ptr.vmem [resolvable:$false] %s827_s11 }
  0x5b   : > { %665 = vmatpush3.bf16.msra.mxu0 %v752_v9  ;;  %v633_v28 = vld [vmem:[%s1167_s4] ss:$0 sm:$0xff]  ;;  %s829_s17 = scalar_lea.vmem %s828_s11, 256  ;;  %p830_p10 = scmp.lt.s32.totalorder %s1121_s16, %s828_s11 }
  0x5c   : > { %v637_v40 = vld [vmem:[%s1169_s6] ss:$0 sm:$0xff]  ;;  %p825_p6 = pnand %p824_p4, %p1033_p12  ;;  %p831_p13 = scmp.lt.s32.totalorder %s829_s17, %s823_s20 }
  0x5d   : > { %673 = vmatpush3.bf16.msra.mxu1 %v754_v11 }
  0x5e   : > { %674 = vmatprep.subr.bf16.mxu1 %v899_v8  ;;  %p826_p8 = pneg %p825_p6  ;;  %p832_p3 = por %p831_p13, %p830_p10 }
  0x60   : > { %p833_p7 = pnand %p832_p3, %p826_p8 }
  0x61   : > { %675 = vmatpush3.bf16.msra.mxu1 %v755_v12 }
  0x62   : > { %676 = vmatprep.subr.bf16.mxu1 %v899_v8 }
  0x65   : > { %677 = vmatpush3.bf16.msra.mxu1 %v756_v23 }
  0x66   : > { %678 = vmatprep.subr.bf16.mxu1 %v899_v8 }
  0x69   : > { %679 = vmatpush3.bf16.msra.mxu1 %v757_v24 }
  0x6a   : > { %680 = vmatprep.subr.bf16.mxu1 %v899_v8 }
  0x6d   : > { %681 = vmatpush3.bf16.msra.mxu1 %v758_v25 }
  0x6e   : > { %682 = vmatprep.subr.bf16.mxu1 %v899_v8 }
  0x71   : > { %683 = vmatpush3.bf16.msra.mxu1 %v759_v26 }
  0x72   : > { %684 = vmatprep.subr.bf16.mxu1 %v899_v8 }
  0x75   : > { %685 = vmatpush3.bf16.msra.mxu1 %v760_v27 }
  0xe4   : > { %v314_v2 = vpop.xlane.xlu0 %313 }
  0xe5   : > { %v316_v3 = vmul.f32 0.03125, %v314_v2 }
  0xe7   : > { %v317_v4 = vsub.f32 %v310_v0, %v316_v3 }
  0xe9   : > { %v318_v5 = vmul.f32 %v317_v4, %v317_v4 }
  0xeb   : > { %v319_v6 = vsel %vm311_vm0, %v318_v5, 0.0 }
  0xec   : > { %320 = vadd.xlane.f32.xlu0 %v319_v6 }
 0x179   : > { %v321_v13 = vpop.xlane.xlu0 %320 }
 0x17a   : > { %v322_v14 = vmul.f32 0.03125, %v321_v13 }
 0x17c   : > { %v323_v15 = vadd.f32 1e-05, %v322_v14 }
 0x17e   : > { %761 = vrsqrt.f32 %v323_v15 }
 0x188   : > { %v762_v16 = vpop.eup %761 }
 0x189   : > { %v325_v18 = vmul.f32 %v762_v16, %v317_v4 }
 0x18b   : > { %v333_v20 = vmul.f32 %v631_v17, %v325_v18 }
 0x18d   : > { %v341_v21 = vadd.f32 %v632_v19, %v333_v20 }
 0x18f   : > { %v342_v22 = vpack.c.bf16 %v341_v21, %v341_v21 }
 0x191   : > { %667 = vmatmul.mubr.msk.bf16.vlgmr.msra.gmra.mrb[0].mxu0 %vm311_vm0, %v342_v22 }
 0x264   : > { %v403_v29 = vpop.f32.mrb[0].mxu0 }
 0x265   : > { %v404_v30 = vadd.f32 %v633_v28, %v403_v29  ;;  %v668_v31 = vpop.f32.mrb[1].mxu0 }
 0x266   : > { %v406_v32 = vpop.f32.mrb[2].mxu0 }
 0x267   : > { %v410_v33 = vmul.f32 0.70710677, %v404_v30  ;;  %v669_v34 = vpop.f32.mrb[3].mxu0  ;;  %v409_v36 = vmul.f32 0.5, %v404_v30 }
 0x269   : > { %763 = verf.f32 %v410_v33 }
 0x273   : > { %v764_v35 = vpop.eup %763 }
 0x274   : > { %v412_v37 = vadd.f32 1.0, %v764_v35 }
 0x276   : > { %v413_v38 = vmul.f32 %v412_v37, %v409_v36 }
 0x278   : > { %v414_v39 = vpack.c.bf16 %v413_v38, %v413_v38 }
 0x27a   : > { %687 = vmatmul.mubr.bf16.vlgmr.msra.gmra.mrb[0].mxu1 %v414_v39 }
 0x34d   : > { %v520_v41 = vpop.f32.mrb[0].mxu1 }
 0x34e   : > { %v521_v42 = vadd.f32 %v637_v40, %v520_v41  ;;  %v688_v43 = vpop.f32.mrb[1].mxu1 }
 0x34f   : > { %v523_v44 = vpop.f32.mrb[2].mxu1 }
 0x350   : > { %526 = vst [vmem:[%s308_s9] sm:$0xff] %v521_v42  ;;  %v689_v45 = vpop.f32.mrb[3].mxu1 }
 0x351   : > { %836 = shalt.err (!%p833_p7)
}
 0x352   : > { %s837_s10 = scalar_lea.hbm %s1119_s29, 128  ;;  %s841_s23 = scalar_lea.hbm %s1170_s7, 256 }
 0x353   : > { %p838_p9 = scmp.ne.s32.totalorder %s1119_s29, %s837_s10  ;;  %p842_p0 = scmp.lt.u32.totalorder %s1119_s29, %s1170_s7 }
 0x354   : > { %p843_p11 = scmp.lt.u32.totalorder %s841_s23, %s837_s10  ;;  %p845_p4 = scmp.lt.u32.totalorder %s837_s10, %s1119_s29 }
 0x355   : > { %p839_p2 = pnand %p838_p9, %p1033_p12 }
 0x356   : > { %p844_p1 = por %p843_p11, %p842_p0 }
 0x357   : > { %p840_p5 = pneg %p839_p2 }
 0x358   : > { %p846_p6 = por %p845_p4, %p844_p1 }
 0x35a   : > { %p847_p8 = pnand %p846_p6, %p840_p5 }
 0x35c   : > { %850 = shalt.err (!%p847_p8)
}
 0x35d   : > { %696 = dma.vmem_to_hbm [thread:$0]  (%p1033_p12), %s1121_s16, 128, %s1119_s29, %s528_s28  }
 0x35e PF: > { %s553_s14 = sand.u32 1, %s881_s24   ;;  %p1185_p10 = scmp.ne.s32.totalorder %s1175_s8, 0 }
 0x35f   : > { %p1186_p13 = scmp.ge.s32.totalorder %s893_s27, 2  ;;  %s554_s15 = scalar_lea.sflag [#allocation4], %s553_s14 }
 0x361   : > { %p707_p3 = pnand %p1186_p13, %p1185_p10 }
 0x363   : > { %876 = dma.done.wait (!%p707_p3), %s554_s15, 128  }
 0x364   : > { %878 = vsyncadd (!%p707_p3), %s554_s15, 4294967168  ;;  %p21_p7 = scmp.ge.s32.totalorder %s998_s13, 4   ;;  %s1187_s24 = smov %s885_s25 }
 0x365   : > { %s1188_s25 = smov %s889_s26  ;;  %s1189_s26 = smov %s1029_s18 }
 0x366   : > { %s1190_s27 = smov %s998_s13  ;;  %23 = sbr.rel (!%p21_p7) target bundleno = 6 (0x6), region = 97 }
 0x36d   :  { %559 = vsyncpa [#allocation3], 1 }
 0x36e   :  { %561 = vsyncpa [#allocation3 + $0x1], 1 }
 0x36f   :  { %562 = vsyncpa [#allocation6], 1 }
 0x370   :  { %563 = vsyncpa [#allocation4], 1 }
 0x371   :  { %565 = vsyncpa [#allocation4 + $0x1], 1 }

</bundles_post_ra>
